<compile_context>
chip_gen: v7x
topology: tpu7x:2x2x1
jax: 0.10.0
libtpu: 0.0.40
codegen_flags: <defaults>
</compile_context>

<pallas_src>
import functools

import jax
import jax.numpy as jnp
from jax import lax
from jax.experimental import pallas as pl
from jax.experimental.pallas import tpu as pltpu

EPS = 1e-6


def _round_up(x, m):
    return ((x + m - 1) // m) * m


def _vmem_budget_bytes():
    """~75% of physical per-core VMEM; conservative fallback if query fails."""
    try:
        cap = int(pltpu.get_tpu_info().vmem_capacity_bytes)
    except Exception:
        cap = 64 << 20                  # v7x per-TensorCore VMEM (smallest gen)
    return min((cap * 3) // 4, 100 << 20)   # 48 MiB v7x, ~96 MiB v5e/v6e


def _ccl_kernel(labels_ref, feat_ref, w_ref, out_ref,
                class_acc, counts_acc, class_mean_ref, mean_nm2_ref, nx2_ref,
                *maybe_cache,
                num_classes: int, inv_n: float, tile_n: int, use_cache: bool):
    feat_cache = maybe_cache[0] if use_cache else None
    phase = pl.program_id(0)
    tile = pl.program_id(1)
    single_tile = nx2_ref.shape[1] == tile_n            # static Python bool

    def tile_cols():
        if single_tile:
            return slice(None)
        return pl.ds(pl.multiple_of(tile * tile_n, tile_n), tile_n)

    labels = labels_ref[...]                                       # (1, T) int32
    class_iota = lax.broadcasted_iota(jnp.int32, (num_classes, tile_n), 0)
    onehot = (labels == class_iota).astype(jnp.float32)            # (C, T)

    # ------- phase 0: class sums / counts, ||x||^2, bf16 feature cache -------
    @pl.when(phase == 0)
    def _stats():
        @pl.when(tile == 0)
        def _init():
            class_acc[...] = jnp.zeros_like(class_acc)
            counts_acc[...] = jnp.zeros_like(counts_acc)

        feats = feat_ref[...]
        feats_f32 = feats.astype(jnp.float32)
        feats_bf16 = feats.astype(jnp.bfloat16)

        counts_acc[...] += jnp.sum(onehot, axis=1, keepdims=True)  # (C, 1)
        # One-hot "scatter-add" as an MXU matmul (one-hot is exact in bf16,
        # f32 accumulation): (C, T) @ (T, D) -> (C, D).
        class_acc[...] += lax.dot_general(
            onehot.astype(jnp.bfloat16), feats_bf16,
            dimension_numbers=(((1,), (0,)), ((), ())),
            preferred_element_type=jnp.float32)

        # Per-sample ||x||^2 from the native-precision tile, lane-dense (1, T);
        # computed here (not in the phase-1 hot loop) and stored once.
        sq = feats_f32 * feats_f32
        ones_row = jnp.ones((1, sq.shape[1]), jnp.float32)
        nx2 = lax.dot_general(ones_row, sq,
                              dimension_numbers=(((1,), (1,)), ((), ())),
                              preferred_element_type=jnp.float32)  # (1, T)
        nx2_ref[:, tile_cols()] = nx2

        if use_cache:
            feat_cache[tile_cols(), :] = feats_bf16   # single HBM pass overall

    # ------- phase 1: per-sample cosine dissimilarity ------------------------
    @pl.when(phase == 1)
    def _loss():
        @pl.when(tile == 0)
        def _finalize_stats():
            # Empty classes (count == 0) are never gathered by any sample, so
            # max(count, 1) only guards div-by-zero (same effect as the
            # reference's `if len(list_category[i]) > 0` branch).
            inv_cnt = 1.0 / jnp.maximum(counts_acc[...], 1.0)       # (C, 1)
            snorm2 = jnp.sum(class_acc[...] * class_acc[...], axis=1,
                             keepdims=True)
            mean_nm2_ref[...] = snorm2 * inv_cnt * inv_cnt          # ||mean||^2
            # Pre-scaled bf16 class means, written once (hoisted out of loop).
            class_mean_ref[...] = (class_acc[...] * inv_cnt).astype(jnp.bfloat16)
            out_ref[...] = jnp.zeros_like(out_ref)

        if use_cache:
            feats_bf16 = feat_cache[tile_cols(), :]
        else:
            feats_bf16 = feat_ref[...].astype(jnp.bfloat16)

        # <mean_c, x_j> for all (c, j): bf16 MXU, contraction over D -> (C, T).
        scores = lax.dot_general(
            class_mean_ref[...], feats_bf16,
            dimension_numbers=(((1,), (1,)), ((), ())),
            preferred_element_type=jnp.float32)

        # Gather each sample's own-class quantities -> lane-dense (1, T).
        mean_dot = jnp.sum(onehot * scores, axis=0, keepdims=True)
        mean_nm2 = jnp.sum(onehot * mean_nm2_ref[...], axis=0, keepdims=True)
        nx2 = nx2_ref[:, tile_cols()]

        # cos = <mean, x> / max(||mean|| * ||x||, eps); one fused rsqrt (EUP).
        cos = mean_dot * lax.rsqrt(jnp.maximum(nx2 * mean_nm2, EPS * EPS))
        w = w_ref[...].astype(jnp.float32)                          # (1, T)
        out_ref[...] += inv_n * jnp.sum(w * (1.0 - jnp.abs(cos)))


def causal_consistency_loss(flatten_features, data_label, weight, num_classes,
                            *, tile_n=None):
    """flatten_features: (N, D), data_label: (N,) int, weight: (N,) float."""
    n, d = flatten_features.shape
    itemsize = flatten_features.dtype.itemsize

    if tile_n is None:
        # Size the feature block by bytes (~2 MiB per DMA), not rows.
        rows = max(128, (2 << 20) // max(d * itemsize, 1))
        tile_n = min(max(_round_up(rows, 128), 512), 4096)
    if _round_up(n, 8) <= tile_n:
        tile_n = _round_up(n, 8)                  # single tile covers the batch
    n_pad = _round_up(n, tile_n)
    if tile_n % 128 != 0 and n_pad != tile_n:
        raise ValueError("tile_n must be a multiple of 128 or cover the padded batch")
    num_tiles = n_pad // tile_n

    # Pad the batch: extra rows get label == num_classes (matches no class) and
    # weight == 0, so they contribute nothing.  Features stay in native dtype;
    # any casting happens inside the kernel.
    feats = flatten_features
    labels = data_label.astype(jnp.int32)
    w = weight.astype(jnp.float32)
    if n_pad != n:
        feats = jnp.pad(feats, ((0, n_pad - n), (0, 0)))
        labels = jnp.pad(labels, (0, n_pad - n), constant_values=num_classes)
        w = jnp.pad(w, (0, n_pad - n))
    labels = labels.reshape(1, n_pad)             # lane-dense scalar layouts
    w = w.reshape(1, n_pad)

    # ---- VMEM budget (generation-aware) & resident bf16 feature cache -------
    budget = _vmem_budget_bytes()
    feats_block_bytes = tile_n * d * itemsize
    base_bytes = (2 * feats_block_bytes                 # double-buffered feats
                  + 4 * 2 * tile_n * 4                  # labels + weights blocks
                  + num_classes * d * 6                 # class_acc f32 + mean bf16
                  + 4 * num_classes * 128 * 4           # small (C,1) scratch (padded)
                  + n_pad * 4                           # ||x||^2 scratch
                  + (4 << 20))                          # headroom / internal scratch
    cache_bytes = n_pad * d * 2                         # bf16 feature cache
    use_cache = num_tiles > 1 and (base_bytes + cache_bytes) <= budget
    vmem_est = base_bytes + (cache_bytes if use_cache else 0)
    vmem_limit = int(min(max(vmem_est, 32 << 20), budget))

    kernel = functools.partial(_ccl_kernel, num_classes=num_classes,
                               inv_n=1.0 / float(n), tile_n=tile_n,
                               use_cache=use_cache)

    if use_cache:
        # Phase 0 streams each feature tile from HBM exactly once; phase 1 pins
        # the last block so no re-fetch happens (it reads the VMEM cache).
        last = num_tiles - 1
        feats_map = lambda p, t: (t * (1 - p) + last * p, 0)
    else:
        feats_map = lambda p, t: (t, 0)

    scratch = [
        pltpu.VMEM((num_classes, d), jnp.float32),      # class feature sums
        pltpu.VMEM((num_classes, 1), jnp.float32),      # class counts
        pltpu.VMEM((num_classes, d), jnp.bfloat16),     # pre-scaled class means
        pltpu.VMEM((num_classes, 1), jnp.float32),      # ||mean_c||^2
        pltpu.VMEM((1, n_pad), jnp.float32),            # per-sample ||x||^2
    ]
    if use_cache:
        scratch.append(pltpu.VMEM((n_pad, d), jnp.bfloat16))   # feature cache

    out = pl.pallas_call(
        kernel,
        out_shape=jax.ShapeDtypeStruct((1, 1), jnp.float32),
        grid_spec=pltpu.PrefetchScalarGridSpec(
            num_scalar_prefetch=0,
            grid=(2, num_tiles),                                    # (phase, tile)
            in_specs=[
                pl.BlockSpec((1, tile_n), lambda p, t: (0, t)),     # labels (1, N)
                pl.BlockSpec((tile_n, d), feats_map),               # features (N, D)
                pl.BlockSpec((1, tile_n), lambda p, t: (0, t * p)), # weights (1, N)
            ],
            out_specs=pl.BlockSpec((1, 1), lambda p, t: (0, 0)),    # resident acc
            scratch_shapes=scratch),
        compiler_params=pltpu.CompilerParams(
            # Both axes MUST stay "arbitrary": phase 1 reads stats written
            # across all of phase 0 and out/class_acc are resident accumulators.
            dimension_semantics=("arbitrary", "arbitrary"),
            vmem_limit_bytes=vmem_limit),
    )(labels, feats, w)
    return out[0, 0]


def _reference(flatten_features, data_label, weight, num_classes):
    """Pure-JAX f32 reference mirroring the PyTorch loop semantics (no MXU)."""
    x = flatten_features.astype(jnp.float32)
    w = weight.astype(jnp.float32)
    n = x.shape[0]
    total = jnp.float32(0.0)
    for c in range(num_classes):
        mask = data_label == c
        cnt = jnp.sum(mask.astype(jnp.float32))
        mean_c = (jnp.sum(jnp.where(mask[:, None], x, 0.0), axis=0)
                  / jnp.maximum(cnt, 1.0))
        dotp = jnp.sum(x * mean_c[None, :], axis=1)
        denom = jnp.maximum(jnp.sqrt(jnp.sum(x * x, axis=1))
                            * jnp.sqrt(jnp.sum(mean_c * mean_c)), EPS)
        cos = dotp / denom
        contrib = jnp.sum(jnp.where(mask, w * (1.0 - jnp.abs(cos)), 0.0))
        total = total + jnp.where(cnt > 0, contrib, 0.0)
    return total / n


if __name__ == "__main__":
    key = jax.random.PRNGKey(0)
    k1, k2, k3 = jax.random.split(key, 3)

    N, D, NUM_CLASSES = 200, 32, 5
    flatten_features = jax.random.normal(k1, (N, D), dtype=jnp.float32)
    data_label = jax.random.randint(k2, (N,), 0, NUM_CLASSES, dtype=jnp.int32)
    weight = jax.random.uniform(k3, (N,), dtype=jnp.float32)

    ref = _reference(flatten_features, data_label, weight, NUM_CLASSES)

    # Multi-tile path: N=200 pads to 256 -> two 128-row tiles, exercises the
    # resident bf16 VMEM feature cache (single HBM pass over the features).
    loss_tiled = causal_consistency_loss(flatten_features, data_label, weight,
                                         NUM_CLASSES, tile_n=128)
    loss_tiled = jax.block_until_ready(loss_tiled)
    assert jnp.allclose(loss_tiled, ref, rtol=2e-2, atol=2e-3), (loss_tiled, ref)

    # Default byte-sized tiling -> single resident tile covering the batch.
    loss_single = causal_consistency_loss(flatten_features, data_label, weight,
                                          NUM_CLASSES)
    loss_single = jax.block_until_ready(loss_single)
    assert jnp.allclose(loss_single, ref, rtol=2e-2, atol=2e-3), (loss_single, ref)

    print("KERNEL_OK")
</pallas_src>

<mosaic_0001>
module attributes {stable_mosaic.version = 11 : i64} {
  func.func @_ccl_kernel(%arg0: i32, %arg1: i32, %arg2: memref<1x128xi32, #tpu.memory_space<vmem>>, %arg3: memref<128x32xf32, #tpu.memory_space<vmem>>, %arg4: memref<1x128xf32, #tpu.memory_space<vmem>>, %arg5: memref<1x1xf32, #tpu.memory_space<vmem>>, %arg6: memref<5x32xf32, #tpu.memory_space<vmem>>, %arg7: memref<5x1xf32, #tpu.memory_space<vmem>>, %arg8: memref<5x32xbf16, #tpu.memory_space<vmem>>, %arg9: memref<5x1xf32, #tpu.memory_space<vmem>>, %arg10: memref<1x256xf32, #tpu.memory_space<vmem>>, %arg11: memref<256x32xbf16, #tpu.memory_space<vmem>>) attributes {dimension_semantics = [#tpu.dimension_semantics<arbitrary>, #tpu.dimension_semantics<arbitrary>], iteration_bounds = array<i64: 2, 2>, scalar_prefetch = 0 : i64, scratch_operands = 6 : i64, tpu.core_type = #tpu.core_type<tc>, window_params = [{transform_indices = @transform_0, window_bounds = array<i64: 1, 128>}, {transform_indices = @transform_1, window_bounds = array<i64: 128, 32>}, {transform_indices = @transform_2, window_bounds = array<i64: 1, 128>}, {pipeline_mode = #tpu.pipeline_mode<synchronous>, transform_indices = @transform_3, window_bounds = array<i64: 1, 1>}]} {
    %c0 = arith.constant 0 : index
    %c0_0 = arith.constant 0 : index
    %0 = vector.load %arg2[%c0, %c0_0] : memref<1x128xi32, #tpu.memory_space<vmem>>, vector<1x128xi32>
    %1 = tpu.iota {dimensions = array<i32: 0>} : vector<5x128xi32>
    %2 = vector.broadcast %0 : vector<1x128xi32> to vector<5x128xi32>
    %3 = arith.cmpi eq, %2, %1 : vector<5x128xi32>
    %4 = arith.extui %3 : vector<5x128xi1> to vector<5x128xi32>
    %5 = arith.sitofp %4 : vector<5x128xi32> to vector<5x128xf32>
    %c0_i32 = arith.constant 0 : i32
    %6 = arith.cmpi eq, %arg0, %c0_i32 : i32
    %7 = arith.extui %6 : i1 to i32
    %c0_i32_1 = arith.constant 0 : i32
    %8 = arith.cmpi ne, %7, %c0_i32_1 : i32
    scf.if %8 {
      %c0_i32_3 = arith.constant 0 : i32
      %12 = arith.cmpi eq, %arg1, %c0_i32_3 : i32
      %13 = arith.extui %12 : i1 to i32
      %c0_i32_4 = arith.constant 0 : i32
      %14 = arith.cmpi ne, %13, %c0_i32_4 : i32
      scf.if %14 {
        %cst_21 = arith.constant 0.000000e+00 : f32
        %38 = vector.broadcast %cst_21 : f32 to vector<5x32xf32>
        %c0_22 = arith.constant 0 : index
        %c0_23 = arith.constant 0 : index
        %39 = vector.load %arg6[%c0_22, %c0_23] : memref<5x32xf32, #tpu.memory_space<vmem>>, vector<5x32xf32>
        tpu.vector_store %arg6[%c0_22, %c0_23], %38 {strides = array<i32>} : memref<5x32xf32, #tpu.memory_space<vmem>>, vector<5x32xf32>,
        %cst_24 = arith.constant 0.000000e+00 : f32
        %40 = vector.broadcast %cst_24 : f32 to vector<5x1xf32>
        %c0_25 = arith.constant 0 : index
        %c0_26 = arith.constant 0 : index
        %41 = vector.load %arg7[%c0_25, %c0_26] : memref<5x1xf32, #tpu.memory_space<vmem>>, vector<5x1xf32>
        tpu.vector_store %arg7[%c0_25, %c0_26], %40 {strides = array<i32>} : memref<5x1xf32, #tpu.memory_space<vmem>>, vector<5x1xf32>,
      } else {
      }
      %c0_5 = arith.constant 0 : index
      %c0_6 = arith.constant 0 : index
      %15 = vector.load %arg3[%c0_5, %c0_6] : memref<128x32xf32, #tpu.memory_space<vmem>>, vector<128x32xf32>
      %16 = arith.truncf %15 : vector<128x32xf32> to vector<128x32xbf16>
      %c0_7 = arith.constant 0 : index
      %c0_8 = arith.constant 0 : index
      %17 = vector.load %arg7[%c0_7, %c0_8] : memref<5x1xf32, #tpu.memory_space<vmem>>, vector<5x1xf32>
      %cst = arith.constant dense<0.000000e+00> : vector<5xf32>
      %18 = vector.multi_reduction <add>, %5, %cst [1] : vector<5x128xf32> to vector<5xf32>
      %19 = vector.shape_cast %18 : vector<5xf32> to vector<5x1xf32>
      %20 = arith.addf %17, %19 : vector<5x1xf32>
      %c0_9 = arith.constant 0 : index
      %c0_10 = arith.constant 0 : index
      %21 = vector.load %arg7[%c0_9, %c0_10] : memref<5x1xf32, #tpu.memory_space<vmem>>, vector<5x1xf32>
      tpu.vector_store %arg7[%c0_9, %c0_10], %20 {strides = array<i32>} : memref<5x1xf32, #tpu.memory_space<vmem>>, vector<5x1xf32>,
      %c0_11 = arith.constant 0 : index
      %c0_12 = arith.constant 0 : index
      %22 = vector.load %arg6[%c0_11, %c0_12] : memref<5x32xf32, #tpu.memory_space<vmem>>, vector<5x32xf32>
      %23 = arith.truncf %5 : vector<5x128xf32> to vector<5x128xbf16>
      %cst_13 = arith.constant dense<0.000000e+00> : vector<5x32xf32>
      %24 = tpu.matmul %23, %16, %cst_13 {dimension_numbers = #tpu.dot_dimension_numbers<[1], [0], [0], [1], [0, 0, 1, 1], [], []>} : vector<5x128xbf16>, vector<128x32xbf16>, vector<5x32xf32> -> vector<5x32xf32>
      %25 = arith.addf %22, %24 : vector<5x32xf32>
      %c0_14 = arith.constant 0 : index
      %c0_15 = arith.constant 0 : index
      %26 = vector.load %arg6[%c0_14, %c0_15] : memref<5x32xf32, #tpu.memory_space<vmem>>, vector<5x32xf32>
      tpu.vector_store %arg6[%c0_14, %c0_15], %25 {strides = array<i32>} : memref<5x32xf32, #tpu.memory_space<vmem>>, vector<5x32xf32>,
      %27 = arith.mulf %15, %15 : vector<128x32xf32>
      %cst_16 = arith.constant 1.000000e+00 : f32
      %28 = vector.broadcast %cst_16 : f32 to vector<1x32xf32>
      %cst_17 = arith.constant dense<0.000000e+00> : vector<1x128xf32>
      %29 = tpu.matmul %28, %27, %cst_17 {dimension_numbers = #tpu.dot_dimension_numbers<[1], [1], [0], [0], [0, 0, 1, 0], [], []>} : vector<1x32xf32>, vector<128x32xf32>, vector<1x128xf32> -> vector<1x128xf32>
      %c128_i32 = arith.constant 128 : i32
      %30 = arith.muli %arg1, %c128_i32 : i32
      %31 = tpu.assume_multiple %30, 128 : i32
      %c0_18 = arith.constant 0 : index
      %32 = arith.index_cast %31 : i32 to index
      %33 = vector.load %arg10[%c0_18, %32] : memref<1x256xf32, #tpu.memory_space<vmem>>, vector<1x128xf32>
      tpu.vector_store %arg10[%c0_18, %32], %29 {strides = array<i32>} : memref<1x256xf32, #tpu.memory_space<vmem>>, vector<1x128xf32>,
      %c128_i32_19 = arith.constant 128 : i32
      %34 = arith.muli %arg1, %c128_i32_19 : i32
      %35 = tpu.assume_multiple %34, 128 : i32
      %36 = arith.index_cast %35 : i32 to index
      %c0_20 = arith.constant 0 : index
      %37 = vector.load %arg11[%36, %c0_20] : memref<256x32xbf16, #tpu.memory_space<vmem>>, vector<128x32xbf16>
      tpu.vector_store %arg11[%36, %c0_20], %16 {strides = array<i32>} : memref<256x32xbf16, #tpu.memory_space<vmem>>, vector<128x32xbf16>,
    } else {
    }
    %c1_i32 = arith.constant 1 : i32
    %9 = arith.cmpi eq, %arg0, %c1_i32 : i32
    %10 = arith.extui %9 : i1 to i32
    %c0_i32_2 = arith.constant 0 : i32
    %11 = arith.cmpi ne, %10, %c0_i32_2 : i32
    scf.if %11 {
      %c0_i32_3 = arith.constant 0 : i32
      %12 = arith.cmpi eq, %arg1, %c0_i32_3 : i32
      %13 = arith.extui %12 : i1 to i32
      %c0_i32_4 = arith.constant 0 : i32
      %14 = arith.cmpi ne, %13, %c0_i32_4 : i32
      scf.if %14 {
        %c0_24 = arith.constant 0 : index
        %c0_25 = arith.constant 0 : index
        %52 = vector.load %arg7[%c0_24, %c0_25] : memref<5x1xf32, #tpu.memory_space<vmem>>, vector<5x1xf32>
        %cst_26 = arith.constant 1.000000e+00 : f32
        %53 = vector.broadcast %cst_26 : f32 to vector<5x1xf32>
        %54 = arith.maximumf %52, %53 : vector<5x1xf32>
        %cst_27 = arith.constant 1.000000e+00 : f32
        %55 = vector.broadcast %cst_27 : f32 to vector<5x1xf32>
        %56 = arith.divf %55, %54 : vector<5x1xf32>
        %c0_28 = arith.constant 0 : index
        %c0_29 = arith.constant 0 : index
        %57 = vector.load %arg6[%c0_28, %c0_29] : memref<5x32xf32, #tpu.memory_space<vmem>>, vector<5x32xf32>
        %c0_30 = arith.constant 0 : index
        %c0_31 = arith.constant 0 : index
        %58 = vector.load %arg6[%c0_30, %c0_31] : memref<5x32xf32, #tpu.memory_space<vmem>>, vector<5x32xf32>
        %59 = arith.mulf %57, %58 : vector<5x32xf32>
        %cst_32 = arith.constant dense<0.000000e+00> : vector<5xf32>
        %60 = vector.multi_reduction <add>, %59, %cst_32 [1] : vector<5x32xf32> to vector<5xf32>
        %61 = vector.shape_cast %60 : vector<5xf32> to vector<5x1xf32>
        %62 = arith.mulf %61, %56 : vector<5x1xf32>
        %63 = arith.mulf %62, %56 : vector<5x1xf32>
        %c0_33 = arith.constant 0 : index
        %c0_34 = arith.constant 0 : index
        %64 = vector.load %arg9[%c0_33, %c0_34] : memref<5x1xf32, #tpu.memory_space<vmem>>, vector<5x1xf32>
        tpu.vector_store %arg9[%c0_33, %c0_34], %63 {strides = array<i32>} : memref<5x1xf32, #tpu.memory_space<vmem>>, vector<5x1xf32>,
        %c0_35 = arith.constant 0 : index
        %c0_36 = arith.constant 0 : index
        %65 = vector.load %arg6[%c0_35, %c0_36] : memref<5x32xf32, #tpu.memory_space<vmem>>, vector<5x32xf32>
        %66 = vector.broadcast %56 : vector<5x1xf32> to vector<5x32xf32>
        %67 = arith.mulf %65, %66 : vector<5x32xf32>
        %68 = arith.truncf %67 : vector<5x32xf32> to vector<5x32xbf16>
        %c0_37 = arith.constant 0 : index
        %c0_38 = arith.constant 0 : index
        %69 = vector.load %arg8[%c0_37, %c0_38] : memref<5x32xbf16, #tpu.memory_space<vmem>>, vector<5x32xbf16>
        tpu.vector_store %arg8[%c0_37, %c0_38], %68 {strides = array<i32>} : memref<5x32xbf16, #tpu.memory_space<vmem>>, vector<5x32xbf16>,
        %cst_39 = arith.constant 0.000000e+00 : f32
        %70 = vector.broadcast %cst_39 : f32 to vector<1x1xf32>
        %c0_40 = arith.constant 0 : index
        %c0_41 = arith.constant 0 : index
        %71 = vector.load %arg5[%c0_40, %c0_41] : memref<1x1xf32, #tpu.memory_space<vmem>>, vector<1x1xf32>
        tpu.vector_store %arg5[%c0_40, %c0_41], %70 {strides = array<i32>} : memref<1x1xf32, #tpu.memory_space<vmem>>, vector<1x1xf32>,
      } else {
      }
      %c128_i32 = arith.constant 128 : i32
      %15 = arith.muli %arg1, %c128_i32 : i32
      %16 = tpu.assume_multiple %15, 128 : i32
      %17 = arith.index_cast %16 : i32 to index
      %c0_5 = arith.constant 0 : index
      %18 = vector.load %arg11[%17, %c0_5] : memref<256x32xbf16, #tpu.memory_space<vmem>>, vector<128x32xbf16>
      %c0_6 = arith.constant 0 : index
      %c0_7 = arith.constant 0 : index
      %19 = vector.load %arg8[%c0_6, %c0_7] : memref<5x32xbf16, #tpu.memory_space<vmem>>, vector<5x32xbf16>
      %cst = arith.constant dense<0.000000e+00> : vector<5x128xf32>
      %20 = tpu.matmul %19, %18, %cst {dimension_numbers = #tpu.dot_dimension_numbers<[1], [1], [0], [0], [0, 0, 1, 0], [], []>} : vector<5x32xbf16>, vector<128x32xbf16>, vector<5x128xf32> -> vector<5x128xf32>
      %21 = arith.mulf %5, %20 : vector<5x128xf32>
      %cst_8 = arith.constant dense<0.000000e+00> : vector<128xf32>
      %22 = vector.multi_reduction <add>, %21, %cst_8 [0] : vector<5x128xf32> to vector<128xf32>
      %23 = vector.shape_cast %22 : vector<128xf32> to vector<1x128xf32>
      %c0_9 = arith.constant 0 : index
      %c0_10 = arith.constant 0 : index
      %24 = vector.load %arg9[%c0_9, %c0_10] : memref<5x1xf32, #tpu.memory_space<vmem>>, vector<5x1xf32>
      %25 = vector.broadcast %24 : vector<5x1xf32> to vector<5x128xf32>
      %26 = arith.mulf %5, %25 : vector<5x128xf32>
      %cst_11 = arith.constant dense<0.000000e+00> : vector<128xf32>
      %27 = vector.multi_reduction <add>, %26, %cst_11 [0] : vector<5x128xf32> to vector<128xf32>
      %28 = vector.shape_cast %27 : vector<128xf32> to vector<1x128xf32>
      %c128_i32_12 = arith.constant 128 : i32
      %29 = arith.muli %arg1, %c128_i32_12 : i32
      %30 = tpu.assume_multiple %29, 128 : i32
      %c0_13 = arith.constant 0 : index
      %31 = arith.index_cast %30 : i32 to index
      %32 = vector.load %arg10[%c0_13, %31] : memref<1x256xf32, #tpu.memory_space<vmem>>, vector<1x128xf32>
      %33 = arith.mulf %32, %28 : vector<1x128xf32>
      %cst_14 = arith.constant 9.99999996E-13 : f32
      %34 = vector.broadcast %cst_14 : f32 to vector<1x128xf32>
      %35 = arith.maximumf %33, %34 : vector<1x128xf32>
      %36 = math.rsqrt %35 : vector<1x128xf32>
      %37 = arith.mulf %23, %36 : vector<1x128xf32>
      %c0_15 = arith.constant 0 : index
      %c0_16 = arith.constant 0 : index
      %38 = vector.load %arg4[%c0_15, %c0_16] : memref<1x128xf32, #tpu.memory_space<vmem>>, vector<1x128xf32>
      %c0_17 = arith.constant 0 : index
      %c0_18 = arith.constant 0 : index
      %39 = vector.load %arg5[%c0_17, %c0_18] : memref<1x1xf32, #tpu.memory_space<vmem>>, vector<1x1xf32>
      %40 = math.absf %37 : vector<1x128xf32>
      %cst_19 = arith.constant 1.000000e+00 : f32
      %41 = vector.broadcast %cst_19 : f32 to vector<1x128xf32>
      %42 = arith.subf %41, %40 : vector<1x128xf32>
      %43 = arith.mulf %38, %42 : vector<1x128xf32>
      %44 = vector.shape_cast %43 : vector<1x128xf32> to vector<1x1x128xf32>
      %cst_20 = arith.constant dense<0.000000e+00> : vector<1xf32>
      %45 = vector.multi_reduction <add>, %44, %cst_20 [1, 2] : vector<1x1x128xf32> to vector<1xf32>
      %46 = vector.shape_cast %45 : vector<1xf32> to vector<1x1x1xf32>
      %47 = vector.extract %46[0, 0, 0] : f32 from vector<1x1x1xf32>
      %cst_21 = arith.constant 5.000000e-03 : f32
      %48 = arith.mulf %cst_21, %47 : f32
      %49 = vector.broadcast %48 : f32 to vector<1x1xf32>
      %50 = arith.addf %39, %49 : vector<1x1xf32>
      %c0_22 = arith.constant 0 : index
      %c0_23 = arith.constant 0 : index
      %51 = vector.load %arg5[%c0_22, %c0_23] : memref<1x1xf32, #tpu.memory_space<vmem>>, vector<1x1xf32>
      tpu.vector_store %arg5[%c0_22, %c0_23], %50 {strides = array<i32>} : memref<1x1xf32, #tpu.memory_space<vmem>>, vector<1x1xf32>,
    } else {
    }
    return
  }
  func.func @transform_0(%arg0: i32, %arg1: i32) -> (i32, i32) {
    %c0_i32 = arith.constant 0 : i32
    %c0_i32_0 = arith.constant 0 : i32
    return %c0_i32, %arg1 : i32, i32
  }
  func.func @transform_1(%arg0: i32, %arg1: i32) -> (i32, i32) {
    %c1_i32 = arith.constant 1 : i32
    %0 = arith.subi %c1_i32, %arg0 : i32
    %1 = arith.muli %arg1, %0 : i32
    %c1_i32_0 = arith.constant 1 : i32
    %2 = arith.muli %c1_i32_0, %arg0 : i32
    %3 = arith.addi %1, %2 : i32
    %c0_i32 = arith.constant 0 : i32
    %c0_i32_1 = arith.constant 0 : i32
    return %3, %c0_i32 : i32, i32
  }
  func.func @transform_2(%arg0: i32, %arg1: i32) -> (i32, i32) {
    %0 = arith.muli %arg1, %arg0 : i32
    %c0_i32 = arith.constant 0 : i32
    %c0_i32_0 = arith.constant 0 : i32
    return %c0_i32, %0 : i32, i32
  }
  func.func @transform_3(%arg0: i32, %arg1: i32) -> (i32, i32) {
    %c0_i32 = arith.constant 0 : i32
    %c0_i32_0 = arith.constant 0 : i32
    %c0_i32_1 = arith.constant 0 : i32
    return %c0_i32, %c0_i32_0 : i32, i32
  }
}

</mosaic_0001>

<bundles_post_ra>
// kernel: tpu_custom_call.1
= control target key start
LH: loop header
LB: loop body
LE: loop exit
PB: predicated region body
PF: predicated region fallthrough
CT: control target
= control target key end

     0   :  { %8 = vsyncpa [#allocation9], 0  ;;  %s1092_s12 = smov 0   ;;  %s1094_s13 = smov 0   ;;  %s1318_s0 = inlined_call_operand.vmem [shape: s32[1,256], index: 0, kind: input, shape index: {}]   ;;  %s1319_s1 = inlined_call_operand.vmem [shape: f32[256,32], index: 1, kind: input, shape index: {}]   ;;  %s1320_s2 = inlined_call_operand.vmem [shape: f32[1,256], index: 2, kind: input, shape index: {}]   ;;  %s1321_s3 = inlined_call_operand.hbm [shape: f32[1,1], index: 3, kind: output, shape index: {}]  }
   0x1   :  { %s1096_s14 = smov 0   ;;  %s1098_s15 = smov 0  }
   0x2   :  { %s1100_s16 = smov 0  }
   0x3 LB: > { %s740_s17 = sadd.s32 4294967295, %s1057_s16   ;;  %s23_s18 = sadd.s32 1, %s1049_s14  ;;  %s1057_s16 = sphi %s1100_s16, %s14_s16   ;;  %s1053_s15 = sphi %s1098_s15, %s1328_s15   ;;  %s1049_s14 = sphi %s1096_s14, %s1327_s14   ;;  %s1045_s13 = sphi %s1094_s13, %s1326_s13   ;;  %s1041_s12 = sphi %s1092_s12, %s1325_s12  }
   0x4   : > { %p24_p0 = scmp.ge.s32.totalorder %s23_s18, 2  ;;  %s26_s19 = sadd.s32 1, %s1053_s15 }
   0x5   : > { %p743_p1 = scmp.ge.s32.totalorder %s1057_s16, 1  ;;  %p178_p2 = scmp.lt.s32.totalorder %s1057_s16, 5 }
   0x6   : > { %s1330_s18 = smov (%p24_p0, %s23_s18), 0  ;;  %s1332_s19 = smov (!%p24_p0, %s26_s19), %s1053_s15 }
   0x7   : > { %p179_p3 = pnand %p743_p1, %p178_p2  ;;  %p28_p4 = scmp.ge.s32.totalorder %s1332_s19, 2 }
   0x8   : > { %p207_p5 = scmp.lt.s32.totalorder (!%p179_p3), %s1041_s12, 1  ;;  %s210_s20 = ssub.s32 (!%p179_p3), 1, %s1045_s13  ;;  %v229_v0 = vlaneseq (!%p179_p3)  ;;  %v1059_v3 = vmov (!%p179_p3), 0.0  }
   0x9   : > { %s1334_s19 = smov (%p28_p4, %s1332_s19), 0  ;;  %182 = sbr.rel (%p179_p3) target bundleno = 1024 (0x400), region = 32 }
   0xa   : > { %s211_s21 = smul.u32 (!%p179_p3), %s1041_s12, %s210_s20  ;;  %v1132_v1 = vshrl.u32 (!%p179_p3), %v229_v0, 7  ;;  %p748_p8 = scmp.ne.s32.totalorder (!%p179_p3), %s1045_s13, 0 }
   0xb   : > { %s222_s24 = smul.u32 (!%p179_p3), %s1041_s12, %s1045_s13 }
   0xc   : > { %s212_s23 = sadd.s32 (!%p179_p3), %s1045_s13, %s211_s21 }
   0xd   : > { %s744_s28 = sshll.u32 (!%p179_p3), %s212_s23, 4  ;;  %p223_p7 = scmp.lt.s32.totalorder (!%p179_p3), %s222_s24, 1 }
   0xe   : > { %p214_p6 = scmp.lt.s32.totalorder (!%p179_p3), %s744_s28, 31 }
  0x10   : > { %s208_s22 = scalar_select %p207_p5, %s1041_s12, 1 }
  0x11   : > { %s1336_s28 = smov (!%p214_p6, %s744_s28), 31  ;;  %s1338_s24 = smov (!%p223_p7, %s222_s24), 1 }
  0x12   : > { %s209_s27 = scalar_lea.vmem %s1318_s0, %s208_s22  ;;  %s745_s29 = sshll.u32 %s1336_s28, 3 }
  0x13   : > { %v1140_v2 = vld [vmem:[%s209_s27] ss:$0 sm:$0xff]  ;;  %s1154_s5 = scalar_lea.vmem %s1319_s1, %s745_s29  ;;  %s225_s8 = scalar_lea.vmem %s1320_s2, %s1338_s24 }
  0x14   : > { %vm235_vm0 = vcmp.eq.s32.totalorder %v1140_v2, %v1132_v1  ;;  %241 = sbr.rel (%p748_p8) target bundleno = 315 (0x13b), region = 36  ;;  %p749_p9 = scmp.ne.s32.totalorder (!%p748_p8), %s1041_s12, 0 }
  0x15   : > { %v1147_v4 = vsel %vm235_vm0, 1.0, %v1059_v3 }
  0x1b   : > { %245 = sbr.rel (%p749_p9) target bundleno = 34 (0x22), region = 40  ;;  %vm246_vm1 = vcmask (!%p749_p9), 258048   ;;  %vm248_vm2 = vcmask (!%p749_p9), 4096   ;;  %v1060_v5 = vmov (!%p749_p9), 0.0  }
  0x1c   : > { %247 = vst.msk [vmem:[#allocation2] sm:$0x1f] (!%p749_p9), %vm246_vm1, %v1060_v5 }
  0x1d   : > { %249 = vst.msk [vmem:[#allocation3] sm:$0x1f] (!%p749_p9), %vm248_vm2, %v1060_v5 }
  0x22 PF: > { %v250_v6 = vld [vmem:[%s1154_s5] sm:$0xff]  ;;  %v251_v7 = vld [vmem:[%s1154_s5 + $0x8] sm:$0xff]  ;;  %vm343_vm3 = vcmask 261120   ;;  %v1061_v8 = vmov 0.0|0.0   ;;  %v1062_v11 = vmov 0.0   ;;  %v252_v13 = vld [vmem:[%s1154_s5 + $0x10] sm:$0xff] }
  0x23   : > { %890 = vmatprep.subr.bf16.mxu1 %v1061_v8  ;;  %v327_v9 = vmul.f32 %v250_v6, %v250_v6  ;;  %v328_v10 = vmul.f32 %v251_v7, %v251_v7  ;;  %815 = vmatprep.subr.bf16.mxu0 %v1062_v11  ;;  %vm1168_vm4 = vmpackc.low %vm343_vm3, %vm343_vm3  ;;  %v253_v14 = vld [vmem:[%s1154_s5 + $0x18] sm:$0xff]  ;;  %v1174_v15 = vpack.c.bf16 %v251_v7, %v250_v6  ;;  %vm1063_vm5 = vmmov 0   ;;  %v254_v20 = vld [vmem:[%s1154_s5 + $0x20] sm:$0xff]  ;;  %s769_s9 = sshll.u32 %s1041_s12, 7 }
  0x24   : > { %831 = vmatprep.mubr.msk.bf16.mxu0 %vm1063_vm5, %v1062_v11  ;;  %867 = vmatprep.mubr.msk.f32.mxu1 %vm1063_vm5, %v1062_v11  ;;  %v1179_v17 = vpack.c.bf16 %v253_v14, %v252_v13  ;;  %v329_v18 = vmul.f32 %v252_v13, %v252_v13  ;;  %v330_v19 = vmul.f32 %v253_v14, %v253_v14  ;;  %v255_v21 = vld [vmem:[%s1154_s5 + $0x28] sm:$0xff]  ;;  %vm275_vm6 = vcmask 1044480   ;;  %v256_v25 = vld [vmem:[%s1154_s5 + $0x30] sm:$0xff]  ;;  %v257_v26 = vld [vmem:[%s1154_s5 + $0x38] sm:$0xff]  ;;  %s474_s10 = sshra.s32 %s769_s9, 4  ;;  %s466_s21 = sshra.s32 %s769_s9, 7 }
  0x25   : > { %v891_v16 = vpack.c.bf16 %v328_v10, %v327_v9  ;;  %816 = vmatpush3.bf16.msra.mxu0 %v1174_v15  ;;  %v1188_v22 = vpack.c.bf16 %v255_v21, %v254_v20  ;;  %v276_v24 = vsel %vm275_vm6, %v1147_v4, 0.0  ;;  %v1195_v27 = vpack.c.bf16 %v257_v26, %v256_v25  ;;  %v258_v30 = vld [vmem:[%s1154_s5 + $0x40] sm:$0xff]  ;;  %v259_v31 = vld [vmem:[%s1154_s5 + $0x48] sm:$0xff]  ;;  %v260_v34 = vld [vmem:[%s1154_s5 + $0x50] sm:$0xff]  ;;  %s770_s11 = sshll.u32 %s474_s10, 3  ;;  %s468_s22 = scalar_lea.vmem [#allocation6], %s466_s21 }
  0x26   : > { %817 = vmatprep.subr.bf16.mxu0 %v1062_v11  ;;  %v895_v23 = vpack.c.bf16 %v330_v19, %v329_v18  ;;  %277 = vadd.xlane.f32.xlu0 %v276_v24  ;;  %v331_v28 = vmul.f32 %v254_v20, %v254_v20  ;;  %v332_v29 = vmul.f32 %v255_v21, %v255_v21  ;;  %v261_v35 = vld [vmem:[%s1154_s5 + $0x58] sm:$0xff]  ;;  %v262_v39 = vld [vmem:[%s1154_s5 + $0x60] sm:$0xff]  ;;  %v263_v40 = vld [vmem:[%s1154_s5 + $0x68] sm:$0xff]  ;;  %v1064_v49 = vmov 1.0|1.0   ;;  %s477_s20 = scalar_lea.vmem [#allocation7], %s770_s11 }
  0x27   : > { %893 = vmatpush3.bf16.xpose.msk.msra.mxu1 %vm1168_vm4, %v891_v16  ;;  %v270_v32 = vpack.c.bf16 %v259_v31, %v258_v30  ;;  %v271_v36 = vpack.c.bf16 %v261_v35, %v260_v34  ;;  %v333_v37 = vmul.f32 %v256_v25, %v256_v25  ;;  %v334_v38 = vmul.f32 %v257_v26, %v257_v26  ;;  %v264_v43 = vld [vmem:[%s1154_s5 + $0x70] sm:$0xff]  ;;  %v265_v44 = vld [vmem:[%s1154_s5 + $0x78] sm:$0xff]  ;;  %vm750_vm7 = vmpackc.low %vm235_vm0, %vm235_vm0 }
  0x28   : > { %894 = vmatprep.subr.bf16.mxu1 %v1061_v8  ;;  %v899_v33 = vpack.c.bf16 %v332_v29, %v331_v28  ;;  %v272_v41 = vpack.c.bf16 %v263_v40, %v262_v39  ;;  %v273_v45 = vpack.c.bf16 %v265_v44, %v264_v43  ;;  %v335_v46 = vmul.f32 %v258_v30, %v258_v30  ;;  %v274_v60 = vld [vmem:[#allocation3] sm:$0x1f]  ;;  %v282_v63 = vld [vmem:[#allocation2] sm:$0x1f] }
  0x29   : > { %818 = vmatpush3.bf16.msra.mxu0 %v1179_v17  ;;  %v903_v42 = vpack.c.bf16 %v334_v38, %v333_v37  ;;  %v336_v47 = vmul.f32 %v259_v31, %v259_v31  ;;  %v337_v50 = vmul.f32 %v260_v34, %v260_v34  ;;  %v338_v51 = vmul.f32 %v261_v35, %v261_v35 }
  0x2a   : > { %819 = vmatprep.subr.bf16.mxu0 %v1062_v11  ;;  %v339_v53 = vmul.f32 %v262_v39, %v262_v39  ;;  %v340_v54 = vmul.f32 %v263_v40, %v263_v40  ;;  %v341_v56 = vmul.f32 %v264_v43, %v264_v43  ;;  %v342_v57 = vmul.f32 %v265_v44, %v265_v44 }
  0x2b   : > { %v907_v48 = vpack.c.bf16 %v336_v47, %v335_v46  ;;  %v911_v52 = vpack.c.bf16 %v338_v51, %v337_v50  ;;  %v1065_v59 = vmov 1.0   ;;  %vm280_vm8 = vcmask 4096   ;;  %478 = vst.msk [vmem:[%s477_s20] sm:$0xff] %vm343_vm3, %v1174_v15  ;;  %479 = vst.msk [vmem:[%s477_s20 + $0x8] sm:$0xff] %vm343_vm3, %v1179_v17 }
  0x2c   : > { %v915_v55 = vpack.c.bf16 %v340_v54, %v339_v53  ;;  %v919_v58 = vpack.c.bf16 %v342_v57, %v341_v56  ;;  %480 = vst.msk [vmem:[%s477_s20 + $0x10] sm:$0xff] %vm343_vm3, %v1188_v22  ;;  %481 = vst.msk [vmem:[%s477_s20 + $0x18] sm:$0xff] %vm343_vm3, %v1195_v27  ;;  %vm325_vm9 = vcmask 258048   ;;  %vm471_vm10 = vcmp.lt.s32.totalorder %v229_v0, 128 }
  0x2d   : > { %820 = vmatpush3.bf16.msra.mxu0 %v1188_v22  ;;  %482 = vst.msk [vmem:[%s477_s20 + $0x20] sm:$0xff] %vm343_vm3, %v270_v32  ;;  %483 = vst.msk [vmem:[%s477_s20 + $0x28] sm:$0xff] %vm343_vm3, %v271_v36 }
  0x2e   : > { %821 = vmatprep.subr.bf16.mxu0 %v1062_v11  ;;  %484 = vst.msk [vmem:[%s477_s20 + $0x30] sm:$0xff] %vm343_vm3, %v272_v41  ;;  %485 = vst.msk [vmem:[%s477_s20 + $0x38] sm:$0xff] %vm343_vm3, %v273_v45 }
  0x2f   : > { %897 = vmatpush3.bf16.xpose.msk.msra.mxu1 %vm1168_vm4, %v895_v23 }
  0x30   : > { %898 = vmatprep.subr.bf16.mxu1 %v1061_v8 }
  0x31   : > { %822 = vmatpush3.bf16.msra.mxu0 %v1195_v27 }
  0x32   : > { %823 = vmatprep.subr.bf16.mxu0 %v1062_v11 }
  0x35   : > { %824 = vmatpush3.bf16.msra.mxu0 %v270_v32 }
  0x36   : > { %825 = vmatprep.subr.bf16.mxu0 %v1062_v11 }
  0x37   : > { %901 = vmatpush3.bf16.xpose.msk.msra.mxu1 %vm1168_vm4, %v899_v33 }
  0x38   : > { %902 = vmatprep.subr.bf16.mxu1 %v1061_v8 }
  0x39   : > { %826 = vmatpush3.bf16.msra.mxu0 %v271_v36 }
  0x3a   : > { %827 = vmatprep.subr.bf16.mxu0 %v1062_v11 }
  0x3d   : > { %828 = vmatpush3.bf16.msra.mxu0 %v272_v41 }
  0x3e   : > { %829 = vmatprep.subr.bf16.mxu0 %v1062_v11 }
  0x3f   : > { %905 = vmatpush3.bf16.xpose.msk.msra.mxu1 %vm1168_vm4, %v903_v42 }
  0x40   : > { %906 = vmatprep.subr.bf16.mxu1 %v1061_v8 }
  0x41   : > { %830 = vmatpush3.bf16.msra.mxu0 %v273_v45 }
  0x44   : > { %832 = vmatmul.mubr.msk.bf16.vlgmr.msra.gmra.mrb[0].mxu0 %vm750_vm7, %v1064_v49 }
  0x47   : > { %909 = vmatpush3.bf16.xpose.msk.msra.mxu1 %vm1168_vm4, %v907_v48 }
  0x48   : > { %910 = vmatprep.subr.bf16.mxu1 %v1061_v8 }
  0x4f   : > { %913 = vmatpush3.bf16.xpose.msk.msra.mxu1 %vm1168_vm4, %v911_v52 }
  0x50   : > { %914 = vmatprep.subr.bf16.mxu1 %v1061_v8 }
  0x57   : > { %917 = vmatpush3.bf16.xpose.msk.msra.mxu1 %vm1168_vm4, %v915_v55 }
  0x58   : > { %918 = vmatprep.subr.bf16.mxu1 %v1061_v8 }
  0x5f   : > { %921 = vmatpush3.bf16.xpose.msk.msra.mxu1 %vm1168_vm4, %v919_v58 }
  0x66   : > { %868 = vmatmul.mubr.msk.f32.vlgmr.msra.gmra.mrb[0].mxu1 %vm343_vm3, %v1065_v59 }
  0xb3   : > { %v278_v61 = vpop.xlane.xlu0 %277 }
  0xb4   : > { %v279_v62 = vadd.f32 %v278_v61, %v274_v60 }
  0xb6   : > { %281 = vst.msk [vmem:[#allocation3] sm:$0x1f] %vm280_vm8, %v279_v62 }
 0x117   : > { %v318_v1 = vpop.f32.mrb[0].mxu0 }
 0x118   : > { %v324_v2 = vadd.f32 %v318_v1, %v282_v63  ;;  %v833_v3 = vpop.f32.mrb[1].mxu0 }
 0x119   : > { %v321_v5 = vpop.f32.mrb[2].mxu0 }
 0x11a   : > { %326 = vst.msk [vmem:[#allocation2] sm:$0x1f] %vm325_vm9, %v324_v2  ;;  %v834_v6 = vpop.f32.mrb[3].mxu0 }
 0x139   : > { %v461_v7 = vpop.f32.mrb[0].mxu1 }
 0x13a   : > { %473 = vst.msk [vmem:[%s468_s22] sm:$0x1] %vm471_vm10, %v461_v7  ;;  %v869_v8 = vpop.f32.mrb[1].mxu1 }
 0x13b PF: > { %p771_p10 = scmp.ne.s32.totalorder %s1045_s13, 1 }
 0x13c   : > { %p772_p11 = scmp.ne.s32.totalorder (!%p771_p10), %s1041_s12, 0 }
 0x13d   : > { %489 = sbr.rel (%p771_p10) target bundleno = 999 (0x3e7), region = 44 }
 0x144   : > { %493 = sbr.rel (%p772_p11) target bundleno = 484 (0x1e4), region = 48  ;;  %v498_v9 = vld [vmem:[#allocation2] sm:$0x1f] (!%p772_p11)  ;;  %vm500_vm11 = vcmask (!%p772_p11), 258048   ;;  %v1066_v11 = vmov (!%p772_p11), 0   ;;  %vm522_vm12 = vcmask (!%p772_p11), 0  }
 0x145   : > { %v499_v10 = vmul.f32 (!%p772_p11), %v498_v9, %v498_v9  ;;  %983 = vset.pattern.permute.xlu0 (!%p772_p11), %v1066_v11  ;;  %v494_v13 = vld [vmem:[#allocation3] sm:$0x1f] (!%p772_p11)  ;;  %v1067_v15 = vmov (!%p772_p11), 0.0   ;;  %vm506_vm13 = vcmask (!%p772_p11), 4096   ;;  %v508_v19 = vld [vmem:[#allocation2] sm:$0x1f] (!%p772_p11) }
 0x146   : > { %v495_v0 = vmax.f32 (!%p772_p11), %v494_v13, 1.0  ;;  %523 = vst.msk [vmem:[#allocation8] sm:$0x1] (!%p772_p11), %vm522_vm12, %v1067_v15  ;;  %vm516_vm14 = vcmask (!%p772_p11), 256000   ;;  %vm517_vm15 = vsmask.f32 (!%p772_p11), 2304 }
 0x147   : > { %v501_v12 = vsel (!%p772_p11), %vm500_vm11, %v499_v10, 0.0  ;;  %vm518_vm0 = vmand (!%p772_p11), %vm516_vm14, %vm517_vm15  ;;  %v519_v22 = vld [vmem:[#allocation4] sm:$0x7] (!%p772_p11) }
 0x148   : > { %502 = vadd.xlane.f32.xlu0 (!%p772_p11), %v501_v12  ;;  %984 = vrcp.f32 (!%p772_p11), %v495_v0 }
 0x152   : > { %v985_v14 = vpop.eup %984 }
 0x15e   : > { %511 = vperm.xlu0 %983, %v985_v14  }
 0x1d5   : > { %v503_v16 = vpop.xlane.xlu0 %502 }
 0x1d6   : > { %v504_v17 = vmul.f32 %v985_v14, %v503_v16 }
 0x1d8   : > { %v505_v18 = vmul.f32 %v985_v14, %v504_v17 }
 0x1da   : > { %507 = vst.msk [vmem:[#allocation5] sm:$0x1f] %vm506_vm13, %v505_v18 }
 0x1dd   : > { %v512_v20 = vpop.permute.xlu0 %511 }
 0x1de   : > { %v514_v21 = vmul.f32 %v512_v20, %v508_v19 }
 0x1e0   : > { %v515_v23 = vpack.c.bf16 %v514_v21, %v514_v21 }
 0x1e2   : > { %v520_v24 = vsel %vm518_vm0, %v515_v23, %v519_v22 }
 0x1e3   : > { %521 = vst [vmem:[#allocation4] sm:$0x7] %v520_v24 }
 0x1e4 PF: > { %s773_s13 = sshll.u32 %s1041_s12, 7  ;;  %v1068_v25 = vmov 0.0   ;;  %vm1069_vm1 = vmmov 0   ;;  %v615_v26 = vld [vmem:[#allocation5] sm:$0x1f]  ;;  %vm538_vm2 = vcmask 261120  }
 0x1e5   : > { %870 = vmatprep.subr.bf16.mxu0 %v1068_v25  ;;  %s525_s23 = sshra.s32 %s773_s13, 4  ;;  %886 = vmatprep.mubr.msk.bf16.mxu0 %vm1069_vm1, %v1068_v25  ;;  %v1070_v27 = vmov 0   ;;  %vm607_vm3 = vcmask 1044480   ;;  %s629_s27 = sshra.s32 %s773_s13, 7  ;;  %vm642_vm4 = vcmask 1040384   ;;  %vm656_vm5 = vcmask 0  }
 0x1e6   : > { %s774_s25 = sshll.u32 %s525_s23, 3  ;;  %986 = vset.pattern.permute.xlu0 %v1070_v27  ;;  %s631_s28 = scalar_lea.vmem [#allocation6], %s629_s27  ;;  %v638_v19 = vld [vmem:[#allocation8] sm:$0x1] }
 0x1e7   : > { %618 = vperm.xlu0 %986, %v615_v26   ;;  %s528_s26 = scalar_lea.vmem [#allocation7], %s774_s25  ;;  %v632_v54 = vld [vmem:[%s631_s28] sm:$0x1] }
 0x1e8   : > { %v529_v28 = vld [vmem:[%s528_s26] sm:$0xff]  ;;  %v530_v30 = vld [vmem:[%s528_s26 + $0x8] sm:$0xff]  ;;  %v531_v32 = vld [vmem:[%s528_s26 + $0x10] sm:$0xff] }
 0x1e9   : > { %v543_v29 = vsel %vm538_vm2, %v529_v28, 0  ;;  %v546_v31 = vsel %vm538_vm2, %v530_v30, 0  ;;  %v549_v33 = vsel %vm538_vm2, %v531_v32, 0  ;;  %v532_v34 = vld [vmem:[%s528_s26 + $0x18] sm:$0xff]  ;;  %v533_v36 = vld [vmem:[%s528_s26 + $0x20] sm:$0xff]  ;;  %v534_v38 = vld [vmem:[%s528_s26 + $0x28] sm:$0xff] }
 0x1ea   : > { %871 = vmatpush3.bf16.xpose.msra.mxu0 %v543_v29  ;;  %v552_v35 = vsel %vm538_vm2, %v532_v34, 0  ;;  %v555_v37 = vsel %vm538_vm2, %v533_v36, 0  ;;  %v558_v39 = vsel %vm538_vm2, %v534_v38, 0  ;;  %v535_v40 = vld [vmem:[%s528_s26 + $0x30] sm:$0xff]  ;;  %v536_v42 = vld [vmem:[%s528_s26 + $0x38] sm:$0xff] }
 0x1eb   : > { %872 = vmatprep.subr.bf16.mxu0 %v1068_v25  ;;  %v561_v41 = vsel %vm538_vm2, %v535_v40, 0  ;;  %v564_v43 = vsel %vm538_vm2, %v536_v42, 0  ;;  %v537_v44 = vld [vmem:[#allocation4] sm:$0x7] }
 0x1f2   : > { %873 = vmatpush3.bf16.xpose.msra.mxu0 %v546_v31 }
 0x1f3   : > { %874 = vmatprep.subr.bf16.mxu0 %v1068_v25 }
 0x1fa   : > { %875 = vmatpush3.bf16.xpose.msra.mxu0 %v549_v33 }
 0x1fb   : > { %876 = vmatprep.subr.bf16.mxu0 %v1068_v25 }
 0x202   : > { %877 = vmatpush3.bf16.xpose.msra.mxu0 %v552_v35 }
 0x203   : > { %878 = vmatprep.subr.bf16.mxu0 %v1068_v25 }
 0x20a   : > { %879 = vmatpush3.bf16.xpose.msra.mxu0 %v555_v37 }
 0x20b   : > { %880 = vmatprep.subr.bf16.mxu0 %v1068_v25 }
 0x212   : > { %881 = vmatpush3.bf16.xpose.msra.mxu0 %v558_v39 }
 0x213   : > { %882 = vmatprep.subr.bf16.mxu0 %v1068_v25 }
 0x21a   : > { %883 = vmatpush3.bf16.xpose.msra.mxu0 %v561_v41 }
 0x21b   : > { %884 = vmatprep.subr.bf16.mxu0 %v1068_v25 }
 0x222   : > { %885 = vmatpush3.bf16.xpose.msra.mxu0 %v564_v43 }
 0x229   : > { %887 = vmatmul.mubr.msk.bf16.vlgmr.msra.gmra.mrb[0].mxu0 %vm538_vm2, %v537_v44 }
 0x266   : > { %v619_v45 = vpop.permute.xlu0 %618 }
 0x267   : > { %v621_v46 = vmul.f32 %v1147_v4, %v619_v45 }
 0x269   : > { %v622_v47 = vsel %vm607_vm3, %v621_v46, 0.0 }
 0x26a   : > { %v623_v48 = vrot.slane %v622_v47, 4 }
 0x26c   : > { %v624_v49 = vadd.f32 %v623_v48, %v622_v47 }
 0x26e   : > { %v625_v50 = vrot.slane %v624_v49, 2 }
 0x270   : > { %v626_v51 = vadd.f32 %v625_v50, %v624_v49 }
 0x272   : > { %v627_v52 = vrot.slane %v626_v51, 1 }
 0x274   : > { %v628_v53 = vadd.f32 %v627_v52, %v626_v51 }
 0x276   : > { %v633_v55 = vmul.f32 %v632_v54, %v628_v53 }
 0x278   : > { %v634_v57 = vmax.f32 %v633_v55, 1e-12 }
 0x27a   : > { %987 = vrsqrt.f32 %v634_v57 }
 0x284   : > { %v988_v7 = vpop.eup %987 }
 0x2fc   : > { %v600_v56 = vpop.f32.mrb[0].mxu0 }
 0x2fd   : > { %v606_v58 = vmul.f32 %v1147_v4, %v600_v56  ;;  %v888_v59 = vpop.f32.mrb[1].mxu0  ;;  %v637_v4 = vld [vmem:[%s225_s8] sm:$0x1] }
 0x2fe   : > { %v603_v60 = vpop.f32.mrb[2].mxu0 }
 0x2ff   : > { %v608_v61 = vsel %vm607_vm3, %v606_v58, 0.0  ;;  %v889_v62 = vpop.f32.mrb[3].mxu0 }
 0x300   : > { %v609_v63 = vrot.slane %v608_v61, 4 }
 0x302   : > { %v610_v1 = vadd.f32 %v609_v63, %v608_v61 }
 0x304   : > { %v611_v2 = vrot.slane %v610_v1, 2 }
 0x306   : > { %v612_v3 = vadd.f32 %v611_v2, %v610_v1 }
 0x308   : > { %v613_v5 = vrot.slane %v612_v3, 1 }
 0x30a   : > { %v614_v6 = vadd.f32 %v613_v5, %v612_v3 }
 0x30c   : > { %v636_v8 = vmul.f32 %v988_v7, %v614_v6 }
 0x30e   : > { %v639_v9 = vand.u32 2147483647, %v636_v8 }
 0x310   : > { %v640_v10 = vsub.f32 1.0, %v639_v9 }
 0x312   : > { %v641_v11 = vmul.f32 %v640_v10, %v637_v4 }
 0x314   : > { %v643_v12 = vsel %vm642_vm4, %v641_v11, 0.0 }
 0x315   : > { %644 = vadd.xlane.f32.xlu0 %v643_v12 }
 0x3a2   : > { %v645_v13 = vpop.xlane.xlu0 %644 }
 0x3a3   : > { %v646_v0 = vrot.slane %v645_v13, 4 }
 0x3a5   : > { %v647_v14 = vadd.f32 %v646_v0, %v645_v13 }
 0x3a7   : > { %v648_v15 = vrot.slane %v647_v14, 2 }
 0x3a9   : > { %v649_v16 = vadd.f32 %v648_v15, %v647_v14 }
 0x3ab   : > { %v650_v17 = vrot.slane %v649_v16, 1 }
 0x3ad   : > { %v651_v18 = vadd.f32 %v650_v17, %v649_v16 }
 0x3af   : > { %922 = vpush %v651_v18 }
 0x3e0   : > { %s923_s30 = spop %922 }
 0x3e1   : > { %s653_s4 = smul.f32 0.005, %s923_s30 }
 0x3e3   : > { %v654_v20 = vstv %s653_s4 }
 0x3e4   : > { %v655_v21 = vadd.f32 %v654_v20, %v638_v19 }
 0x3e6   : > { %657 = vst.msk [vmem:[#allocation8] sm:$0x1] %vm656_vm5, %v655_v21 }
 0x3e7 PF: > { %p1277_p12 = scmp.eq.s32.totalorder %s740_s17, 3  ;;  %s1071_s5 = smov [#allocation8]  }
 0x3e8   : > { %s665_s6 = sshll.u32 %s1071_s5, 4  ;;  %s666_s6 = int_to_ptr.vmem [resolvable:$true] %s665_s6 }
 0x3e9   : > { %s989_s7 = scalar_lea.vmem %s666_s6, 16  ;;  %s995_s8 = scalar_lea.vmem %s666_s6, 32 }
 0x3ea   : > { %p990_p13 = scmp.ne.s32.totalorder %s666_s6, %s989_s7  ;;  %p996_p2 = scmp.lt.s32.totalorder %s666_s6, %s666_s6 }
 0x3eb   : > { %p997_p3 = scmp.lt.s32.totalorder %s995_s8, %s989_s7 }
 0x3ec   : > { %p991_p0 = pnand %p990_p13, %p1277_p12 }
 0x3ed   : > { %p998_p4 = por %p997_p3, %p996_p2 }
 0x3ee   : > { %p992_p1 = pneg %p991_p0 }
 0x3f0   : > { %p999_p5 = pnand %p998_p4, %p992_p1 }
 0x3f2   : > { %1002 = shalt.err (!%p999_p5)
}
 0x3f3   : > { %s1003_s10 = scalar_lea.hbm %s1321_s3, 16 }
 0x3f4   : > { %p1004_p6 = scmp.ne.s32.totalorder %s1321_s3, %s1003_s10  ;;  %p1009_p9 = scmp.lt.u32.totalorder %s1003_s10, %s1321_s3 }
 0x3f6   : > { %p1005_p7 = pnand %p1004_p6, %p1277_p12 }
 0x3f8   : > { %p1006_p8 = pneg %p1005_p7 }
 0x3fa   : > { %p1011_p10 = pnand %p1009_p9, %p1006_p8 }
 0x3fc   : > { %1014 = shalt.err (!%p1011_p10)
}
 0x3fd   : > { %925 = dma.vmem_to_hbm [thread:$0]  (%p1277_p12), %s666_s6, 16, %s1321_s3, [#allocation9]  }
 0x3fe   : > { %1036 = dma.done.wait (%p1277_p12), [#allocation9], 16  }
 0x3ff   : > { %1038 = vsyncadd (%p1277_p12), [#allocation9], 4294967280 }
 0x400 PF: > { %s14_s16 = sadd.s32 1, %s1057_s16   ;;  %s1325_s12 = smov %s1049_s14 }
 0x401   : > { %p11_p11 = scmp.ge.s32.totalorder %s14_s16, 6   ;;  %s1326_s13 = smov %s1053_s15 }
 0x402   : > { %s1327_s14 = smov %s1330_s18  ;;  %s1328_s15 = smov %s1334_s19 }
 0x403   :  { %13 = sbr.rel (!%p11_p11) target bundleno = 3 (0x3), region = 85 }
 0x40a   :  { %678 = vsyncpa [#allocation9], 1 }
 0x40b   :  { %680 = vsyncpa [#allocation9 + $0x1], 1 }

</bundles_post_ra>
